<compile_context>
chip_gen: v6e
topology: v6e:2x2x1
jax: 0.10.0
libtpu: 0.0.40
codegen_flags: <defaults>
</compile_context>

<pallas_src>
import math
import functools

import jax
import jax.numpy as jnp
from jax.experimental import pallas as pl
from jax.experimental.pallas import tpu as pltpu

# ----------------------------- configuration ------------------------------
EMBED_DIM = 32
DENSE_DIM = 64
NUM_HEADS = 4
HEAD_DIM = EMBED_DIM // NUM_HEADS
SEQ_LEN = 8
BATCH = 2
LN_EPS = 1e-5
LANE = 128          # lane width used for the packed small-vector rows


# ------------------------------- kernel -----------------------------------
def _layernorm(x, gamma, beta):
    # x: (N, E), gamma/beta: (1, E); all f32
    mean = jnp.mean(x, axis=-1, keepdims=True)
    diff = x - mean
    var = jnp.mean(diff * diff, axis=-1, keepdims=True)
    inv = jax.lax.rsqrt(var + LN_EPS)
    return diff * inv * gamma + beta


def encoder_kernel(x_ref, wqkv_ref, bqkv_ref, wo_ref, w1_ref, w2_ref, pvec_ref,
                   out_ref, *, seq, embed, dense, heads, head_dim):
    S, E, D, H, Hd = seq, embed, dense, heads, head_dim

    x = x_ref[...]                                   # (S, E) f32, one sequence
    xb = x.astype(jnp.bfloat16)

    # ---- packed bias / gamma / beta vectors --------------------------------
    pv = pvec_ref[...]                               # (8, 128) f32
    bo = pv[0:1, 0:E]
    b1 = pv[1:2, 0:D]
    b2 = pv[2:3, 0:E]
    g1 = pv[3:4, 0:E]
    be1 = pv[4:5, 0:E]
    g2 = pv[5:6, 0:E]
    be2 = pv[6:7, 0:E]

    # ---- fused, head-batched QKV projection (single batched MXU einsum) ----
    # wqkv_ref: (3H, E, Hd) bf16, Q block pre-scaled by 1/sqrt(Hd).
    xg = jnp.broadcast_to(xb, (3 * H, S, E))                              # bf16
    qkv = jnp.einsum('gse,ged->gsd', xg, wqkv_ref[...],
                     preferred_element_type=jnp.float32) + bqkv_ref[...]  # (3H,S,Hd)
    qh = qkv[0:H].astype(jnp.bfloat16)               # (H, S, Hd) leading-dim slice
    kh = qkv[H:2 * H].astype(jnp.bfloat16)
    vh = qkv[2 * H:3 * H].astype(jnp.bfloat16)

    # ---- attention batched over heads (2 MXU einsums, no per-head loop) ----
    s = jnp.einsum('hqd,hkd->hqk', qh, kh,
                   preferred_element_type=jnp.float32)                    # (H,S,S)
    s = s - jnp.max(s, axis=-1, keepdims=True)
    p = jnp.exp(s)
    p = p / jnp.sum(p, axis=-1, keepdims=True)       # exact softmax (f32)
    o = jnp.einsum('hqk,hkd->hqd', p.astype(jnp.bfloat16), vh,
                   preferred_element_type=jnp.float32)                    # (H,S,Hd)

    # ---- output projection: per-head partials, reduce over heads -----------
    attn = jnp.einsum('hsd,hde->hse', o.astype(jnp.bfloat16), wo_ref[...],
                      preferred_element_type=jnp.float32)                 # (H,S,E)
    attn = jnp.sum(attn, axis=0) + bo                                     # (S, E)

    # ---- residual + LayerNorm 1 (f32) ---------------------------------------
    h1 = _layernorm(x + attn, g1, be1)

    # ---- MLP: Linear -> ReLU -> Linear (bf16 matmuls, f32 accumulate) -------
    mid = jnp.dot(h1.astype(jnp.bfloat16), w1_ref[...],
                  preferred_element_type=jnp.float32) + b1
    mid = jnp.maximum(mid, 0.0)
    h2 = jnp.dot(mid.astype(jnp.bfloat16), w2_ref[...],
                 preferred_element_type=jnp.float32) + b2

    # ---- residual + LayerNorm 2 (f32) ---------------------------------------
    out_ref[...] = _layernorm(h1 + h2, g2, be2).astype(out_ref.dtype)


# ------------------------------- wrapper -----------------------------------
def transformer_encoder(x, params):
    B, S, E = x.shape
    D = params["w1"].shape[0]
    H = NUM_HEADS
    Hd = E // H
    scale = 1.0 / math.sqrt(Hd)

    # Head-batched QKV weights: (3H, E, Hd), Q block pre-scaled.  All layout
    # shuffling happens here (host side), so the kernel never transposes.
    def per_head(w):                       # w: (E_out, E_in) -> (H, E_in, Hd)
        return jnp.transpose(w.reshape(H, Hd, E), (0, 2, 1))

    wqkv_h = jnp.concatenate([per_head(params["wq"] * scale),
                              per_head(params["wk"]),
                              per_head(params["wv"])],
                             axis=0).astype(jnp.bfloat16)          # (3H, E, Hd)
    bqkv_h = jnp.concatenate([(params["bq"] * scale).reshape(H, 1, Hd),
                              params["bk"].reshape(H, 1, Hd),
                              params["bv"].reshape(H, 1, Hd)],
                             axis=0).astype(jnp.float32)           # (3H, 1, Hd)
    wo_h = params["wo"].T.reshape(H, Hd, E).astype(jnp.bfloat16)   # (H, Hd, E)
    w1T = params["w1"].T.astype(jnp.bfloat16)                      # (E, D)
    w2T = params["w2"].T.astype(jnp.bfloat16)                      # (D, E)

    # Pack remaining small vectors into one (8, 128) array (single DMA).
    def row(v):
        return jnp.pad(v.astype(jnp.float32), (0, LANE - v.shape[0]))[None, :]

    pvec = jnp.concatenate([
        row(params["bo"]), row(params["b1"]), row(params["b2"]),
        row(params["g1"]), row(params["be1"]),
        row(params["g2"]), row(params["be2"]),
        jnp.zeros((1, LANE), jnp.float32),
    ], axis=0)                                                     # (8, 128)

    kernel = functools.partial(
        encoder_kernel, seq=S, embed=E, dense=D, heads=H, head_dim=Hd)

    const2 = lambda b: (0, 0)
    const3 = lambda b: (0, 0, 0)

    out = pl.pallas_call(
        kernel,
        grid=(B,),                        # batch axis -> both TCs on v7x
        out_shape=jax.ShapeDtypeStruct((B, S, E), x.dtype),
        in_specs=[
            pl.BlockSpec((None, S, E), lambda b: (b, 0, 0)),   # x (one sequence)
            pl.BlockSpec(wqkv_h.shape, const3),                # weights: constant
            pl.BlockSpec(bqkv_h.shape, const3),                #  index maps ->
            pl.BlockSpec(wo_h.shape, const3),                  #  DMA'd once
            pl.BlockSpec(w1T.shape, const2),
            pl.BlockSpec(w2T.shape, const2),
            pl.BlockSpec(pvec.shape, const2),
        ],
        out_specs=pl.BlockSpec((None, S, E), lambda b: (b, 0, 0)),
        compiler_params=pltpu.CompilerParams(
            dimension_semantics=("parallel",)),
    )(x, wqkv_h, bqkv_h, wo_h, w1T, w2T, pvec)
    return out


# --------------------------- pure-JAX reference -----------------------------
def reference(x, p):
    def ln(v, g, b):
        m = jnp.mean(v, axis=-1, keepdims=True)
        var = jnp.mean((v - m) ** 2, axis=-1, keepdims=True)
        return (v - m) / jnp.sqrt(var + LN_EPS) * g + b

    B, S, E = x.shape
    q = x @ p["wq"].T + p["bq"]
    k = x @ p["wk"].T + p["bk"]
    v = x @ p["wv"].T + p["bv"]
    qh = q.reshape(B, S, NUM_HEADS, HEAD_DIM).transpose(0, 2, 1, 3)
    kh = k.reshape(B, S, NUM_HEADS, HEAD_DIM).transpose(0, 2, 1, 3)
    vh = v.reshape(B, S, NUM_HEADS, HEAD_DIM).transpose(0, 2, 1, 3)
    s = jnp.einsum("bhqd,bhkd->bhqk", qh, kh) / math.sqrt(HEAD_DIM)
    pattn = jax.nn.softmax(s, axis=-1)
    o = jnp.einsum("bhqk,bhkd->bhqd", pattn, vh).transpose(0, 2, 1, 3).reshape(B, S, E)
    attn = o @ p["wo"].T + p["bo"]
    proj_in = ln(x + attn, p["g1"], p["be1"])
    h = jnp.maximum(proj_in @ p["w1"].T + p["b1"], 0.0)
    proj_out = h @ p["w2"].T + p["b2"]
    return ln(proj_in + proj_out, p["g2"], p["be2"])


# --------------------------------- main --------------------------------------
def init_params(key):
    ks = jax.random.split(key, 8)
    E, D = EMBED_DIM, DENSE_DIM
    scale_e = 1.0 / math.sqrt(E)
    scale_d = 1.0 / math.sqrt(D)
    # in_proj weight of nn.MultiheadAttention is (3E, E); we split it into q/k/v.
    in_proj = jax.random.uniform(ks[0], (3 * E, E), jnp.float32, -scale_e, scale_e)
    in_bias = jax.random.uniform(ks[1], (3 * E,), jnp.float32, -scale_e, scale_e)
    return {
        "wq": in_proj[:E], "wk": in_proj[E:2 * E], "wv": in_proj[2 * E:],
        "bq": in_bias[:E], "bk": in_bias[E:2 * E], "bv": in_bias[2 * E:],
        "wo": jax.random.uniform(ks[2], (E, E), jnp.float32, -scale_e, scale_e),
        "bo": jax.random.uniform(ks[3], (E,), jnp.float32, -scale_e, scale_e),
        "w1": jax.random.uniform(ks[4], (D, E), jnp.float32, -scale_e, scale_e),
        "b1": jax.random.uniform(ks[5], (D,), jnp.float32, -scale_e, scale_e),
        "w2": jax.random.uniform(ks[6], (E, D), jnp.float32, -scale_d, scale_d),
        "b2": jax.random.uniform(ks[7], (E,), jnp.float32, -scale_d, scale_d),
        "g1": jnp.ones((E,), jnp.float32), "be1": jnp.zeros((E,), jnp.float32),
        "g2": jnp.ones((E,), jnp.float32), "be2": jnp.zeros((E,), jnp.float32),
    }


if __name__ == "__main__":
    key = jax.random.PRNGKey(0)
    k_x, k_p = jax.random.split(key)
    x = jax.random.normal(k_x, (BATCH, SEQ_LEN, EMBED_DIM), jnp.float32)
    params = init_params(k_p)

    out = transformer_encoder(x, params)
    out = jax.block_until_ready(out)

    ref = reference(x, params)
    assert out.shape == (BATCH, SEQ_LEN, EMBED_DIM)
    # bf16 weights/activations on the MXU path (f32 accumulate / LN / softmax)
    # -> tolerance sized for bf16 input quantization vs the f32 reference.
    assert jnp.max(jnp.abs(out - ref)) < 5e-2

    print("KERNEL_OK")
</pallas_src>

<mosaic_0001>
module attributes {stable_mosaic.version = 11 : i64} {
  func.func @encoder_kernel(%arg0: i32, %arg1: memref<1x8x32xf32, #tpu.memory_space<vmem>>, %arg2: memref<12x32x8xbf16, #tpu.memory_space<vmem>>, %arg3: memref<12x1x8xf32, #tpu.memory_space<vmem>>, %arg4: memref<4x8x32xbf16, #tpu.memory_space<vmem>>, %arg5: memref<32x64xbf16, #tpu.memory_space<vmem>>, %arg6: memref<64x32xbf16, #tpu.memory_space<vmem>>, %arg7: memref<8x128xf32, #tpu.memory_space<vmem>>, %arg8: memref<1x8x32xf32, #tpu.memory_space<vmem>>) attributes {dimension_semantics = [#tpu.dimension_semantics<parallel>], iteration_bounds = array<i64: 2>, scalar_prefetch = 0 : i64, scratch_operands = 0 : i64, tpu.core_type = #tpu.core_type<tc>, window_params = [{transform_indices = @transform_0, window_bounds = array<i64: 1, 8, 32>}, {pipeline_mode = #tpu.pipeline_mode<synchronous>, transform_indices = @transform_1, window_bounds = array<i64: 12, 32, 8>}, {pipeline_mode = #tpu.pipeline_mode<synchronous>, transform_indices = @transform_2, window_bounds = array<i64: 12, 1, 8>}, {pipeline_mode = #tpu.pipeline_mode<synchronous>, transform_indices = @transform_3, window_bounds = array<i64: 4, 8, 32>}, {pipeline_mode = #tpu.pipeline_mode<synchronous>, transform_indices = @transform_4, window_bounds = array<i64: 32, 64>}, {pipeline_mode = #tpu.pipeline_mode<synchronous>, transform_indices = @transform_5, window_bounds = array<i64: 64, 32>}, {pipeline_mode = #tpu.pipeline_mode<synchronous>, transform_indices = @transform_6, window_bounds = array<i64: 8, 128>}, {transform_indices = @transform_7, window_bounds = array<i64: 1, 8, 32>}]} {
    %c0 = arith.constant 0 : index
    %c0_0 = arith.constant 0 : index
    %c0_1 = arith.constant 0 : index
    %0 = vector.load %arg1[%c0, %c0_0, %c0_1] : memref<1x8x32xf32, #tpu.memory_space<vmem>>, vector<1x8x32xf32>
    %1 = vector.shape_cast %0 : vector<1x8x32xf32> to vector<8x32xf32>
    %2 = arith.truncf %1 : vector<8x32xf32> to vector<8x32xbf16>
    %c0_2 = arith.constant 0 : index
    %c0_3 = arith.constant 0 : index
    %3 = vector.load %arg7[%c0_2, %c0_3] : memref<8x128xf32, #tpu.memory_space<vmem>>, vector<8x128xf32>
    %4 = vector.extract_strided_slice %3 {offsets = [0, 0], sizes = [1, 32], strides = [1, 1]} : vector<8x128xf32> to vector<1x32xf32>
    %5 = vector.extract_strided_slice %3 {offsets = [1, 0], sizes = [1, 64], strides = [1, 1]} : vector<8x128xf32> to vector<1x64xf32>
    %6 = vector.extract_strided_slice %3 {offsets = [2, 0], sizes = [1, 32], strides = [1, 1]} : vector<8x128xf32> to vector<1x32xf32>
    %7 = vector.extract_strided_slice %3 {offsets = [3, 0], sizes = [1, 32], strides = [1, 1]} : vector<8x128xf32> to vector<1x32xf32>
    %8 = vector.extract_strided_slice %3 {offsets = [4, 0], sizes = [1, 32], strides = [1, 1]} : vector<8x128xf32> to vector<1x32xf32>
    %9 = vector.extract_strided_slice %3 {offsets = [5, 0], sizes = [1, 32], strides = [1, 1]} : vector<8x128xf32> to vector<1x32xf32>
    %10 = vector.extract_strided_slice %3 {offsets = [6, 0], sizes = [1, 32], strides = [1, 1]} : vector<8x128xf32> to vector<1x32xf32>
    %11 = vector.shape_cast %2 : vector<8x32xbf16> to vector<1x8x32xbf16>
    %12 = vector.broadcast %11 : vector<1x8x32xbf16> to vector<12x8x32xbf16>
    %c0_4 = arith.constant 0 : index
    %c0_5 = arith.constant 0 : index
    %c0_6 = arith.constant 0 : index
    %13 = vector.load %arg2[%c0_4, %c0_5, %c0_6] : memref<12x32x8xbf16, #tpu.memory_space<vmem>>, vector<12x32x8xbf16>
    "tpu.trace_start"() <{level = 10 : i32, message = "gse,ged->gsd"}> : () -> ()
    %cst = arith.constant dense<0.000000e+00> : vector<12x8x8xf32>
    %14 = tpu.matmul %12, %13, %cst {dimension_numbers = #tpu.dot_dimension_numbers<[2], [1], [1], [2], [0, 0, 0, 1, 1, 2], [0], [0]>} : vector<12x8x32xbf16>, vector<12x32x8xbf16>, vector<12x8x8xf32> -> vector<12x8x8xf32>
    "tpu.trace_stop"() : () -> ()
    %c0_7 = arith.constant 0 : index
    %c0_8 = arith.constant 0 : index
    %c0_9 = arith.constant 0 : index
    %15 = vector.load %arg3[%c0_7, %c0_8, %c0_9] : memref<12x1x8xf32, #tpu.memory_space<vmem>>, vector<12x1x8xf32>
    %16 = vector.broadcast %15 : vector<12x1x8xf32> to vector<12x8x8xf32>
    %17 = arith.addf %14, %16 : vector<12x8x8xf32>
    %18 = vector.extract_strided_slice %17 {offsets = [0, 0, 0], sizes = [4, 8, 8], strides = [1, 1, 1]} : vector<12x8x8xf32> to vector<4x8x8xf32>
    %19 = arith.truncf %18 : vector<4x8x8xf32> to vector<4x8x8xbf16>
    %20 = vector.extract_strided_slice %17 {offsets = [4, 0, 0], sizes = [4, 8, 8], strides = [1, 1, 1]} : vector<12x8x8xf32> to vector<4x8x8xf32>
    %21 = arith.truncf %20 : vector<4x8x8xf32> to vector<4x8x8xbf16>
    %22 = vector.extract_strided_slice %17 {offsets = [8, 0, 0], sizes = [4, 8, 8], strides = [1, 1, 1]} : vector<12x8x8xf32> to vector<4x8x8xf32>
    %23 = arith.truncf %22 : vector<4x8x8xf32> to vector<4x8x8xbf16>
    "tpu.trace_start"() <{level = 10 : i32, message = "hqd,hkd->hqk"}> : () -> ()
    %cst_10 = arith.constant dense<0.000000e+00> : vector<4x8x8xf32>
    %24 = tpu.matmul %19, %21, %cst_10 {dimension_numbers = #tpu.dot_dimension_numbers<[2], [2], [1], [1], [0, 0, 0, 1, 1, 1], [0], [0]>} : vector<4x8x8xbf16>, vector<4x8x8xbf16>, vector<4x8x8xf32> -> vector<4x8x8xf32>
    "tpu.trace_stop"() : () -> ()
    %cst_11 = arith.constant dense<0xFF800000> : vector<4x8xf32>
    %25 = vector.multi_reduction <maximumf>, %24, %cst_11 [2] : vector<4x8x8xf32> to vector<4x8xf32>
    %26 = vector.shape_cast %25 : vector<4x8xf32> to vector<4x8x1xf32>
    %27 = vector.broadcast %26 : vector<4x8x1xf32> to vector<4x8x8xf32>
    %28 = arith.subf %24, %27 : vector<4x8x8xf32>
    %29 = math.exp %28 : vector<4x8x8xf32>
    %cst_12 = arith.constant dense<0.000000e+00> : vector<4x8xf32>
    %30 = vector.multi_reduction <add>, %29, %cst_12 [2] : vector<4x8x8xf32> to vector<4x8xf32>
    %31 = vector.shape_cast %30 : vector<4x8xf32> to vector<4x8x1xf32>
    %32 = vector.broadcast %31 : vector<4x8x1xf32> to vector<4x8x8xf32>
    %33 = arith.divf %29, %32 : vector<4x8x8xf32>
    %34 = arith.truncf %33 : vector<4x8x8xf32> to vector<4x8x8xbf16>
    "tpu.trace_start"() <{level = 10 : i32, message = "hqk,hkd->hqd"}> : () -> ()
    %cst_13 = arith.constant dense<0.000000e+00> : vector<4x8x8xf32>
    %35 = tpu.matmul %34, %23, %cst_13 {dimension_numbers = #tpu.dot_dimension_numbers<[2], [1], [1], [2], [0, 0, 0, 1, 1, 2], [0], [0]>} : vector<4x8x8xbf16>, vector<4x8x8xbf16>, vector<4x8x8xf32> -> vector<4x8x8xf32>
    "tpu.trace_stop"() : () -> ()
    %36 = arith.truncf %35 : vector<4x8x8xf32> to vector<4x8x8xbf16>
    %c0_14 = arith.constant 0 : index
    %c0_15 = arith.constant 0 : index
    %c0_16 = arith.constant 0 : index
    %37 = vector.load %arg4[%c0_14, %c0_15, %c0_16] : memref<4x8x32xbf16, #tpu.memory_space<vmem>>, vector<4x8x32xbf16>
    "tpu.trace_start"() <{level = 10 : i32, message = "hsd,hde->hse"}> : () -> ()
    %cst_17 = arith.constant dense<0.000000e+00> : vector<4x8x32xf32>
    %38 = tpu.matmul %36, %37, %cst_17 {dimension_numbers = #tpu.dot_dimension_numbers<[2], [1], [1], [2], [0, 0, 0, 1, 1, 2], [0], [0]>} : vector<4x8x8xbf16>, vector<4x8x32xbf16>, vector<4x8x32xf32> -> vector<4x8x32xf32>
    "tpu.trace_stop"() : () -> ()
    %cst_18 = arith.constant dense<0.000000e+00> : vector<8x32xf32>
    %39 = vector.multi_reduction <add>, %38, %cst_18 [0] : vector<4x8x32xf32> to vector<8x32xf32>
    %40 = vector.broadcast %4 : vector<1x32xf32> to vector<8x32xf32>
    %41 = arith.addf %39, %40 : vector<8x32xf32>
    %42 = arith.addf %1, %41 : vector<8x32xf32>
    %cst_19 = arith.constant dense<0.000000e+00> : vector<8xf32>
    %43 = vector.multi_reduction <add>, %42, %cst_19 [1] : vector<8x32xf32> to vector<8xf32>
    %44 = vector.shape_cast %43 : vector<8xf32> to vector<8x1xf32>
    %cst_20 = arith.constant 3.200000e+01 : f32
    %45 = vector.broadcast %cst_20 : f32 to vector<8x1xf32>
    %46 = arith.divf %44, %45 : vector<8x1xf32>
    %47 = vector.broadcast %46 : vector<8x1xf32> to vector<8x32xf32>
    %48 = arith.subf %42, %47 : vector<8x32xf32>
    %49 = arith.mulf %48, %48 : vector<8x32xf32>
    %cst_21 = arith.constant dense<0.000000e+00> : vector<8xf32>
    %50 = vector.multi_reduction <add>, %49, %cst_21 [1] : vector<8x32xf32> to vector<8xf32>
    %51 = vector.shape_cast %50 : vector<8xf32> to vector<8x1xf32>
    %cst_22 = arith.constant 3.200000e+01 : f32
    %52 = vector.broadcast %cst_22 : f32 to vector<8x1xf32>
    %53 = arith.divf %51, %52 : vector<8x1xf32>
    %cst_23 = arith.constant 9.99999974E-6 : f32
    %54 = vector.broadcast %cst_23 : f32 to vector<8x1xf32>
    %55 = arith.addf %53, %54 : vector<8x1xf32>
    %56 = math.rsqrt %55 : vector<8x1xf32>
    %57 = vector.broadcast %56 : vector<8x1xf32> to vector<8x32xf32>
    %58 = arith.mulf %48, %57 : vector<8x32xf32>
    %59 = vector.broadcast %7 : vector<1x32xf32> to vector<8x32xf32>
    %60 = arith.mulf %58, %59 : vector<8x32xf32>
    %61 = vector.broadcast %8 : vector<1x32xf32> to vector<8x32xf32>
    %62 = arith.addf %60, %61 : vector<8x32xf32>
    %63 = arith.truncf %62 : vector<8x32xf32> to vector<8x32xbf16>
    %c0_24 = arith.constant 0 : index
    %c0_25 = arith.constant 0 : index
    %64 = vector.load %arg5[%c0_24, %c0_25] : memref<32x64xbf16, #tpu.memory_space<vmem>>, vector<32x64xbf16>
    %cst_26 = arith.constant dense<0.000000e+00> : vector<8x64xf32>
    %65 = tpu.matmul %63, %64, %cst_26 {dimension_numbers = #tpu.dot_dimension_numbers<[1], [0], [0], [1], [0, 0, 1, 1], [], []>} : vector<8x32xbf16>, vector<32x64xbf16>, vector<8x64xf32> -> vector<8x64xf32>
    %66 = vector.broadcast %5 : vector<1x64xf32> to vector<8x64xf32>
    %67 = arith.addf %65, %66 : vector<8x64xf32>
    %cst_27 = arith.constant 0.000000e+00 : f32
    %68 = vector.broadcast %cst_27 : f32 to vector<8x64xf32>
    %69 = arith.maximumf %67, %68 : vector<8x64xf32>
    %70 = arith.truncf %69 : vector<8x64xf32> to vector<8x64xbf16>
    %c0_28 = arith.constant 0 : index
    %c0_29 = arith.constant 0 : index
    %71 = vector.load %arg6[%c0_28, %c0_29] : memref<64x32xbf16, #tpu.memory_space<vmem>>, vector<64x32xbf16>
    %cst_30 = arith.constant dense<0.000000e+00> : vector<8x32xf32>
    %72 = tpu.matmul %70, %71, %cst_30 {dimension_numbers = #tpu.dot_dimension_numbers<[1], [0], [0], [1], [0, 0, 1, 1], [], []>} : vector<8x64xbf16>, vector<64x32xbf16>, vector<8x32xf32> -> vector<8x32xf32>
    %73 = vector.broadcast %6 : vector<1x32xf32> to vector<8x32xf32>
    %74 = arith.addf %72, %73 : vector<8x32xf32>
    %75 = arith.addf %62, %74 : vector<8x32xf32>
    %cst_31 = arith.constant dense<0.000000e+00> : vector<8xf32>
    %76 = vector.multi_reduction <add>, %75, %cst_31 [1] : vector<8x32xf32> to vector<8xf32>
    %77 = vector.shape_cast %76 : vector<8xf32> to vector<8x1xf32>
    %cst_32 = arith.constant 3.200000e+01 : f32
    %78 = vector.broadcast %cst_32 : f32 to vector<8x1xf32>
    %79 = arith.divf %77, %78 : vector<8x1xf32>
    %80 = vector.broadcast %79 : vector<8x1xf32> to vector<8x32xf32>
    %81 = arith.subf %75, %80 : vector<8x32xf32>
    %82 = arith.mulf %81, %81 : vector<8x32xf32>
    %cst_33 = arith.constant dense<0.000000e+00> : vector<8xf32>
    %83 = vector.multi_reduction <add>, %82, %cst_33 [1] : vector<8x32xf32> to vector<8xf32>
    %84 = vector.shape_cast %83 : vector<8xf32> to vector<8x1xf32>
    %cst_34 = arith.constant 3.200000e+01 : f32
    %85 = vector.broadcast %cst_34 : f32 to vector<8x1xf32>
    %86 = arith.divf %84, %85 : vector<8x1xf32>
    %cst_35 = arith.constant 9.99999974E-6 : f32
    %87 = vector.broadcast %cst_35 : f32 to vector<8x1xf32>
    %88 = arith.addf %86, %87 : vector<8x1xf32>
    %89 = math.rsqrt %88 : vector<8x1xf32>
    %90 = vector.broadcast %89 : vector<8x1xf32> to vector<8x32xf32>
    %91 = arith.mulf %81, %90 : vector<8x32xf32>
    %92 = vector.broadcast %9 : vector<1x32xf32> to vector<8x32xf32>
    %93 = arith.mulf %91, %92 : vector<8x32xf32>
    %94 = vector.broadcast %10 : vector<1x32xf32> to vector<8x32xf32>
    %95 = arith.addf %93, %94 : vector<8x32xf32>
    %c0_36 = arith.constant 0 : index
    %c0_37 = arith.constant 0 : index
    %c0_38 = arith.constant 0 : index
    %96 = vector.load %arg8[%c0_36, %c0_37, %c0_38] : memref<1x8x32xf32, #tpu.memory_space<vmem>>, vector<1x8x32xf32>
    %97 = vector.shape_cast %96 : vector<1x8x32xf32> to vector<8x32xf32>
    %98 = vector.shape_cast %95 : vector<8x32xf32> to vector<1x8x32xf32>
    tpu.vector_store %arg8[%c0_36, %c0_37, %c0_38], %98 {strides = array<i32>} : memref<1x8x32xf32, #tpu.memory_space<vmem>>, vector<1x8x32xf32>,
    return
  }
  func.func @transform_0(%arg0: i32) -> (i32, i32, i32) {
    %c0_i32 = arith.constant 0 : i32
    %c0_i32_0 = arith.constant 0 : i32
    %c0_i32_1 = arith.constant 0 : i32
    return %arg0, %c0_i32, %c0_i32_0 : i32, i32, i32
  }
  func.func @transform_1(%arg0: i32) -> (i32, i32, i32) {
    %c0_i32 = arith.constant 0 : i32
    %c0_i32_0 = arith.constant 0 : i32
    %c0_i32_1 = arith.constant 0 : i32
    %c0_i32_2 = arith.constant 0 : i32
    return %c0_i32, %c0_i32_0, %c0_i32_1 : i32, i32, i32
  }
  func.func @transform_2(%arg0: i32) -> (i32, i32, i32) {
    %c0_i32 = arith.constant 0 : i32
    %c0_i32_0 = arith.constant 0 : i32
    %c0_i32_1 = arith.constant 0 : i32
    %c0_i32_2 = arith.constant 0 : i32
    return %c0_i32, %c0_i32_0, %c0_i32_1 : i32, i32, i32
  }
  func.func @transform_3(%arg0: i32) -> (i32, i32, i32) {
    %c0_i32 = arith.constant 0 : i32
    %c0_i32_0 = arith.constant 0 : i32
    %c0_i32_1 = arith.constant 0 : i32
    %c0_i32_2 = arith.constant 0 : i32
    return %c0_i32, %c0_i32_0, %c0_i32_1 : i32, i32, i32
  }
  func.func @transform_4(%arg0: i32) -> (i32, i32) {
    %c0_i32 = arith.constant 0 : i32
    %c0_i32_0 = arith.constant 0 : i32
    %c0_i32_1 = arith.constant 0 : i32
    return %c0_i32, %c0_i32_0 : i32, i32
  }
  func.func @transform_5(%arg0: i32) -> (i32, i32) {
    %c0_i32 = arith.constant 0 : i32
    %c0_i32_0 = arith.constant 0 : i32
    %c0_i32_1 = arith.constant 0 : i32
    return %c0_i32, %c0_i32_0 : i32, i32
  }
  func.func @transform_6(%arg0: i32) -> (i32, i32) {
    %c0_i32 = arith.constant 0 : i32
    %c0_i32_0 = arith.constant 0 : i32
    %c0_i32_1 = arith.constant 0 : i32
    return %c0_i32, %c0_i32_0 : i32, i32
  }
  func.func @transform_7(%arg0: i32) -> (i32, i32, i32) {
    %c0_i32 = arith.constant 0 : i32
    %c0_i32_0 = arith.constant 0 : i32
    %c0_i32_1 = arith.constant 0 : i32
    return %arg0, %c0_i32, %c0_i32_0 : i32, i32, i32
  }
}

</mosaic_0001>

<bundles_post_ra>
// kernel: tpu_custom_call.1
= control target key start
LH: loop header
LB: loop body
LE: loop exit
PB: predicated region body
PF: predicated region fallthrough
CT: control target
= control target key end

     0   :  { %12 = vsyncpa [#allocation3], 0  ;;  %s2890_s0 = inlined_call_operand.vmem [shape: f32[2,8,32], index: 0, kind: input, shape index: {}]   ;;  %s2891_s1 = inlined_call_operand.vmem [shape: bf16[12,32,8], index: 1, kind: input, shape index: {}]   ;;  %s2892_s2 = inlined_call_operand.vmem [shape: f32[12,1,8], index: 2, kind: input, shape index: {}]   ;;  %s2893_s3 = inlined_call_operand.vmem [shape: bf16[4,8,32], index: 3, kind: input, shape index: {}]   ;;  %s2894_s4 = inlined_call_operand.vmem [shape: bf16[32,64], index: 4, kind: input, shape index: {}]   ;;  %s2895_s5 = inlined_call_operand.vmem [shape: bf16[64,32], index: 5, kind: input, shape index: {}]   ;;  %s2896_s6 = inlined_call_operand.vmem [shape: f32[8,128], index: 6, kind: input, shape index: {}]   ;;  %s2897_s7 = inlined_call_operand.hbm [shape: f32[2,8,32], index: 7, kind: output, shape index: {}]  }
   0x1   :  { %14 = vsyncpa [#allocation3 + $0x1], 0  ;;  %s2471_s24 = smov 0   ;;  %s2473_s25 = smov 0  }
   0x2   :  { %s2475_s26 = smov 0   ;;  %s2477_s27 = smov 0  }
   0x3 LB: > { %s2492_s28 = sadd.s32 4294967295, %s2426_s27   ;;  %s1941_s29 = sadd.s32 4294967294, %s2426_s27   ;;  %s2426_s27 = sphi %s2477_s27, %s2903_s27   ;;  %s2422_s26 = sphi %s2475_s26, %s2902_s26   ;;  %s2418_s25 = sphi %s2473_s25, %s2901_s25   ;;  %s2414_s24 = sphi %s2471_s24, %s2900_s24  }
   0x4   : > { %s2496_s30 = sadd.s32 1, %s2426_s27   ;;  %s179_s8 = sadd.s32 1, %s2422_s26 }
   0x5   : > { %s176_s9 = ssub.s32 %s2426_s27, %s2496_s30  ;;  %p189_p0 = scmp.ne.s32.totalorder %s2422_s26, %s2418_s25 }
   0x6   : > { %p177_p1 = scmp.eq.s32.totalorder %s176_s9, 0  ;;  %p190_p2 = scmp.eq.s32.totalorder %s2492_s28, 1 }
   0x7   : > { %p195_p3 = scmp.ne.s32.totalorder %s2418_s25, %s2414_s24  ;;  %p196_p4 = scmp.eq.s32.totalorder %s1941_s29, 1 }
   0x8   : > { %s2507_s10 = scalar_select %p177_p1, %s2422_s26, %s179_s8  }
   0x9   : > { %p2509_p5 = por %p190_p2, %p189_p0  ;;  %p2513_p6 = por %p196_p4, %p195_p3 }
   0xa   : > { %p1944_p7 = scmp.ge.s32.totalorder %s2426_s27, 1  ;;  %p239_p8 = scmp.lt.s32.totalorder %s2426_s27, 3 }
   0xc   : > { %p240_p9 = pnand %p1944_p7, %p239_p8 }
   0xd   : > { %p270_p10 = scmp.lt.s32.totalorder (!%p240_p9), %s2492_s28, 1  ;;  %s267_s14 = sand.u32 (!%p240_p9), 1, %s2418_s25  }
   0xe   : > { %243 = sbr.rel (%p240_p9) target bundleno = 2190 (0x88e), region = 48  ;;  %s1945_s15 = sshll.u32 (!%p240_p9), %s267_s14, 3 }
   0xf   : > { %s2016_s16 = sshll.u32 (!%p240_p9), %s2492_s28, 7  ;;  %s269_s17 = scalar_lea.vmem (!%p240_p9), [#allocation2], %s1945_s15 }
  0x10   : > { %s1882_s18 = sshll.u32 (!%p240_p9), %s269_s17, 4  ;;  %s2430_s29 = smov (!%p240_p9), [#allocation2]   ;;  %s1883_s18 = int_to_ptr.vmem [resolvable:$true] %s1882_s18 }
  0x11   : > { %s2366_s23 = scalar_lea.vmem (!%p240_p9), %s1883_s18, 128  ;;  %s2370_s8 = sshll.u32 (!%p240_p9), %s2430_s29, 4  ;;  %s2371_s8 = int_to_ptr.vmem [resolvable:$false] %s2370_s8 }
  0x12   : > { %p2367_p11 = scmp.ne.s32.totalorder (!%p240_p9), %s1883_s18, %s2366_s23  ;;  %p2373_p0 = scmp.lt.s32.totalorder (!%p240_p9), %s1883_s18, %s2371_s8 }
  0x13   : > { %v2316_v0 = vld [vmem:[%s2891_s1 + $0x8] sm:$0xff]   ;;  %v2428_v1 = vmov 0.0   ;;  %v2317_v2 = vld [vmem:[%s2891_s1 + $0x18] sm:$0xff]   ;;  %v2318_v3 = vld [vmem:[%s2891_s1] sm:$0xff]   ;;  %vm2429_vm0 = vmmov 0   ;;  %s271_s21 = scalar_select %p270_p10, %s2492_s28, 1 }
  0x14   : > { %2087 = vmatprep.subr.bf16.mxu0 %v2428_v1  ;;  %2095 = vmatprep.subr.bf16.mxu1 %v2428_v1  ;;  %v2319_v4 = vld [vmem:[%s2891_s1 + $0x10] sm:$0xff]   ;;  %v2320_v5 = vld [vmem:[%s2891_s1 + $0x28] sm:$0xff]   ;;  %v2321_v6 = vld [vmem:[%s2891_s1 + $0x38] sm:$0xff]   ;;  %vm422_vm1 = vcmask 261120   ;;  %vm1050_vm2 = vcmask 64512   ;;  %vm1286_vm3 = vcmask 1043456   ;;  %p2368_p12 = pnand %p2367_p11, %p2509_p5 }
  0x15   : > { %2088 = vmatpush3.bf16.msra.mxu0 %v2316_v0  ;;  %2091 = vmatprep.mubr.msk.bf16.mxu0 %vm2429_vm0, %v2428_v1  ;;  %s1946_s22 = sshll.u32 %s271_s21, 3  ;;  %v2322_v9 = vld [vmem:[%s2891_s1 + $0x20] sm:$0xff]   ;;  %v2323_v10 = vld [vmem:[%s2891_s1 + $0x30] sm:$0xff]   ;;  %v2324_v11 = vld [vmem:[%s2891_s1 + $0x48] sm:$0xff]   ;;  %vm1799_vm4 = vcmask 523264   ;;  %s1880_s21 = scalar_lea.hbm %s2897_s7, %s2016_s16 }
  0x16   : > { %2096 = vmatpush3.bf16.msra.mxu1 %v2317_v2  ;;  %2089 = vmatprep.subr.bf16.mxu0 %v2428_v1  ;;  %s273_s13 = scalar_lea.vmem %s2890_s0, %s1946_s22  ;;  %v2325_v12 = vld [vmem:[%s2891_s1 + $0x58] sm:$0xff]   ;;  %v2326_v13 = vld [vmem:[%s2891_s1 + $0x40] sm:$0xff]   ;;  %v2327_v14 = vld [vmem:[%s2891_s1 + $0x50] sm:$0xff]   ;;  %s1869_s22 = scalar_lea.sflag [#allocation3], %s267_s14 }
  0x17   : > { %2097 = vmatprep.subr.bf16.mxu1 %v2428_v1  ;;  %2099 = vmatprep.mubr.msk.bf16.mxu1 %vm2429_vm0, %v2428_v1  ;;  %v2551_v7 = vld [vmem:[%s273_s13] sm:$0xff]  ;;  %v2328_v15 = vld [vmem:[%s2891_s1 + $0x68] sm:$0xff]   ;;  %v2329_v16 = vld [vmem:[%s2891_s1 + $0x78] sm:$0xff]   ;;  %p2369_p13 = pneg %p2368_p12  ;;  %s2372_s28 = scalar_lea.vmem %s2371_s8, 256 }
  0x18   : > { %v2556_v8 = vpack.c.bf16 %v2551_v7, %v2551_v7  ;;  %v2330_v17 = vld [vmem:[%s2891_s1 + $0x60] sm:$0xff]   ;;  %v2331_v18 = vld [vmem:[%s2891_s1 + $0x70] sm:$0xff]   ;;  %v2332_v19 = vld [vmem:[%s2891_s1 + $0x88] sm:$0xff]   ;;  %p2374_p1 = scmp.lt.s32.totalorder %s2372_s28, %s2366_s23 }
  0x19   : > { %2090 = vmatpush3.bf16.msra.mxu0 %v2318_v3  ;;  %v2333_v20 = vld [vmem:[%s2891_s1 + $0x80] sm:$0xff]   ;;  %v2334_v21 = vld [vmem:[%s2891_s1 + $0x98] sm:$0xff]   ;;  %v2335_v22 = vld [vmem:[%s2891_s1 + $0x90] sm:$0xff]  }
  0x1a   : > { %2098 = vmatpush3.bf16.msra.mxu1 %v2319_v4  ;;  %2103 = vmatprep.subr.bf16.mxu0 %v2428_v1  ;;  %v2336_v23 = vld [vmem:[%s2891_s1 + $0xa8] sm:$0xff]   ;;  %v2337_v24 = vld [vmem:[%s2891_s1 + $0xa0] sm:$0xff]   ;;  %v2338_v25 = vld [vmem:[%s2891_s1 + $0xb8] sm:$0xff]   ;;  %p2375_p2 = por %p2374_p1, %p2373_p0 }
  0x1b   : > { %2111 = vmatprep.subr.bf16.mxu1 %v2428_v1  ;;  %v2339_v26 = vld [vmem:[%s2891_s1 + $0xb0] sm:$0xff]   ;;  %v1951_v43 = vld [vmem:[%s2892_s2 + $0x4] ss:$0 sm:$0xff]  ;;  %v1952_v44 = vld [vmem:[%s2892_s2 + $0x5] ss:$0 sm:$0xff] }
  0x1c   : > { %2092 = vmatmul.mubr.msk.bf16.vlgmr.msra.gmra.mxu0 %vm422_vm1, %v2556_v8  ;;  %v1947_v53 = vld [vmem:[%s2892_s2] ss:$0 sm:$0xff]  ;;  %v1948_v54 = vld [vmem:[%s2892_s2 + $0x1] ss:$0 sm:$0xff]  ;;  %v1953_v61 = vld [vmem:[%s2892_s2 + $0x6] ss:$0 sm:$0xff]  ;;  %p2376_p3 = pnand %p2375_p2, %p2369_p13 }
  0x1d   : > { %2100 = vmatmul.mubr.msk.bf16.vlgmr.msra.gmra.mxu1 %vm422_vm1, %v2556_v8  ;;  %2104 = vmatpush3.bf16.msra.mxu0 %v2320_v5  ;;  %v1954_v62 = vld [vmem:[%s2892_s2 + $0x7] ss:$0 sm:$0xff] }
  0x1e   : > { %2112 = vmatpush3.bf16.msra.mxu1 %v2321_v6  ;;  %2105 = vmatprep.subr.bf16.mxu0 %v2428_v1 }
  0x1f   : > { %2113 = vmatprep.subr.bf16.mxu1 %v2428_v1  ;;  %2107 = vmatprep.mubr.msk.bf16.mxu0 %vm2429_vm0, %v2428_v1 }
  0x20   : > { %2115 = vmatprep.mubr.msk.bf16.mxu1 %vm2429_vm0, %v2428_v1 }
  0x21   : > { %2106 = vmatpush3.bf16.msra.mxu0 %v2322_v9 }
  0x22   : > { %2114 = vmatpush3.bf16.msra.mxu1 %v2323_v10  ;;  %2119 = vmatprep.subr.bf16.mxu0 %v2428_v1 }
  0x23   : > { %2127 = vmatprep.subr.bf16.mxu1 %v2428_v1 }
  0x24   : > { %2108 = vmatmul.mubr.msk.bf16.vlgmr.msra.gmra.mxu0 %vm422_vm1, %v2556_v8 }
  0x25   : > { %2116 = vmatmul.mubr.msk.bf16.vlgmr.msra.gmra.mxu1 %vm422_vm1, %v2556_v8  ;;  %2120 = vmatpush3.bf16.msra.mxu0 %v2324_v11 }
  0x26   : > { %2128 = vmatpush3.bf16.msra.mxu1 %v2325_v12  ;;  %2121 = vmatprep.subr.bf16.mxu0 %v2428_v1 }
  0x27   : > { %2129 = vmatprep.subr.bf16.mxu1 %v2428_v1  ;;  %2123 = vmatprep.mubr.msk.bf16.mxu0 %vm2429_vm0, %v2428_v1 }
  0x28   : > { %2131 = vmatprep.mubr.msk.bf16.mxu1 %vm2429_vm0, %v2428_v1 }
  0x29   : > { %2122 = vmatpush3.bf16.msra.mxu0 %v2326_v13  ;;  %v1949_v13 = vld [vmem:[%s2892_s2 + $0x2] ss:$0 sm:$0xff] }
  0x2a   : > { %2130 = vmatpush3.bf16.msra.mxu1 %v2327_v14  ;;  %2135 = vmatprep.subr.bf16.mxu0 %v2428_v1  ;;  %v1950_v14 = vld [vmem:[%s2892_s2 + $0x3] ss:$0 sm:$0xff] }
  0x2b   : > { %2143 = vmatprep.subr.bf16.mxu1 %v2428_v1 }
  0x2c   : > { %2124 = vmatmul.mubr.msk.bf16.vlgmr.msra.gmra.mxu0 %vm422_vm1, %v2556_v8 }
  0x2d   : > { %2132 = vmatmul.mubr.msk.bf16.vlgmr.msra.gmra.mxu1 %vm422_vm1, %v2556_v8  ;;  %2136 = vmatpush3.bf16.msra.mxu0 %v2328_v15 }
  0x2e   : > { %2144 = vmatpush3.bf16.msra.mxu1 %v2329_v16  ;;  %2137 = vmatprep.subr.bf16.mxu0 %v2428_v1 }
  0x2f   : > { %2145 = vmatprep.subr.bf16.mxu1 %v2428_v1  ;;  %2139 = vmatprep.mubr.msk.bf16.mxu0 %vm2429_vm0, %v2428_v1 }
  0x30   : > { %2147 = vmatprep.mubr.msk.bf16.mxu1 %vm2429_vm0, %v2428_v1 }
  0x31   : > { %2138 = vmatpush3.bf16.msra.mxu0 %v2330_v17 }
  0x32   : > { %2146 = vmatpush3.bf16.msra.mxu1 %v2331_v18  ;;  %2151 = vmatprep.subr.bf16.mxu0 %v2428_v1 }
  0x33   : > { %2159 = vmatprep.subr.bf16.mxu1 %v2428_v1 }
  0x34   : > { %2140 = vmatmul.mubr.msk.bf16.vlgmr.msra.gmra.mxu0 %vm422_vm1, %v2556_v8 }
  0x35   : > { %2148 = vmatmul.mubr.msk.bf16.vlgmr.msra.gmra.mxu1 %vm422_vm1, %v2556_v8  ;;  %2155 = vmatprep.mubr.msk.bf16.mxu0 %vm2429_vm0, %v2428_v1 }
  0x36   : > { %2163 = vmatprep.mubr.msk.bf16.mxu1 %vm2429_vm0, %v2428_v1  ;;  %2152 = vmatpush3.bf16.msra.mxu0 %v2332_v19 }
  0x37   : > { %2153 = vmatprep.subr.bf16.mxu0 %v2428_v1  ;;  %2160 = vmatpush3.bf16.msra.mxu1 %v2334_v21 }
  0x38   : > { %2161 = vmatprep.subr.bf16.mxu1 %v2428_v1 }
  0x3a   : > { %2154 = vmatpush3.bf16.msra.mxu0 %v2333_v20 }
  0x3b   : > { %2167 = vmatprep.subr.bf16.mxu0 %v2428_v1  ;;  %2162 = vmatpush3.bf16.msra.mxu1 %v2335_v22 }
  0x3c   : > { %2175 = vmatprep.subr.bf16.mxu1 %v2428_v1 }
  0x3d   : > { %2156 = vmatmul.mubr.msk.bf16.vlgmr.msra.gmra.mxu0 %vm422_vm1, %v2556_v8 }
  0x3e   : > { %2168 = vmatpush3.bf16.msra.mxu0 %v2336_v23  ;;  %2171 = vmatprep.mubr.msk.bf16.mxu0 %vm2429_vm0, %v2428_v1 }
  0x3f   : > { %2169 = vmatprep.subr.bf16.mxu0 %v2428_v1  ;;  %2164 = vmatmul.mubr.msk.bf16.vlgmr.msra.gmra.mxu1 %vm422_vm1, %v2556_v8 }
  0x40   : > { %2176 = vmatpush3.bf16.msra.mxu1 %v2338_v25  ;;  %2179 = vmatprep.mubr.msk.bf16.mxu1 %vm2429_vm0, %v2428_v1  ;;  %v1955_v25 = vld [vmem:[%s2892_s2 + $0x8] ss:$0 sm:$0xff] }
  0x41   : > { %2177 = vmatprep.subr.bf16.mxu1 %v2428_v1 }
  0x42   : > { %2170 = vmatpush3.bf16.msra.mxu0 %v2337_v24 }
  0x43   : > { %2183 = vmatprep.subr.bf16.mxu0 %v2428_v1 }
  0x44   : > { %2178 = vmatpush3.bf16.msra.mxu1 %v2339_v26 }
  0x45   : > { %2172 = vmatmul.mubr.msk.bf16.vlgmr.msra.gmra.mxu0 %vm422_vm1, %v2556_v8  ;;  %2189 = vmatprep.subr.bf16.mxu1 %v2428_v1 }
  0x46   : > { %2185 = vmatprep.mubr.msk.bf16.mxu0 %vm2429_vm0, %v2428_v1 }
  0x47   : > { %2180 = vmatmul.mubr.msk.bf16.vlgmr.msra.gmra.mxu1 %vm422_vm1, %v2556_v8 }
  0x48   : > { %2191 = vmatprep.mubr.msk.bf16.mxu1 %vm2429_vm0, %v2428_v1 }
  0xdc   : > { %v460_v27 = vpop.f32.mrf.mxu0 }
  0xdd   : > { %v512_v28 = vpop.f32.mrf.mxu1  ;;  %v461_v63 = vadd.f32 %v1947_v53, %v460_v27 }
  0xde   : > { %v2093_v29 = vpop.f32.mrf.mxu0  ;;  %v513_v0 = vadd.f32 %v1948_v54, %v512_v28 }
  0xdf   : > { %v2101_v30 = vpop.f32.mrf.mxu1  ;;  %v1038_v9 = vpack.c.bf16 %v461_v63, %v461_v63  ;;  %v1956_v29 = vld [vmem:[%s2892_s2 + $0x9] ss:$0 sm:$0xff] }
  0xe0   : > { %v463_v31 = vpop.f32.mrf.mxu0  ;;  %v1039_v10 = vpack.c.bf16 %v513_v0, %v513_v0 }
  0xe1   : > { %v515_v32 = vpop.f32.mrf.mxu1 }
  0xe2   : > { %v2094_v33 = vpop.f32.mrf.mxu0 }
  0xe3   : > { %v2102_v34 = vpop.f32.mrf.mxu1 }
  0xe4   : > { %v564_v35 = vpop.f32.mrf.mxu0 }
  0xe5   : > { %v616_v36 = vpop.f32.mrf.mxu1  ;;  %v565_v21 = vadd.f32 %v1949_v13, %v564_v35 }
  0xe6   : > { %v2109_v37 = vpop.f32.mrf.mxu0  ;;  %v617_v22 = vadd.f32 %v1950_v14, %v616_v36 }
  0xe7   : > { %v2117_v38 = vpop.f32.mrf.mxu1  ;;  %v1040_v23 = vpack.c.bf16 %v565_v21, %v565_v21 }
  0xe8   : > { %v567_v39 = vpop.f32.mrf.mxu0  ;;  %v1041_v24 = vpack.c.bf16 %v617_v22, %v617_v22 }
  0xe9   : > { %v619_v40 = vpop.f32.mrf.mxu1 }
  0xea   : > { %v2110_v41 = vpop.f32.mrf.mxu0 }
  0xeb   : > { %v2118_v42 = vpop.f32.mrf.mxu1 }
  0xec   : > { %v668_v45 = vpop.f32.mrf.mxu0 }
  0xed   : > { %v720_v46 = vpop.f32.mrf.mxu1  ;;  %v669_v47 = vadd.f32 %v1951_v43, %v668_v45 }
  0xee   : > { %v721_v48 = vadd.f32 %v1952_v44, %v720_v46  ;;  %v2125_v49 = vpop.f32.mrf.mxu0 }
  0xef   : > { %v2133_v50 = vpop.f32.mrf.mxu1  ;;  %v1042_v51 = vpack.c.bf16 %v669_v47, %v669_v47 }
  0xf0   : > { %v1043_v52 = vpack.c.bf16 %v721_v48, %v721_v48  ;;  %v671_v55 = vpop.f32.mrf.mxu0 }
  0xf1   : > { %v723_v56 = vpop.f32.mrf.mxu1  ;;  %v1055_v57 = vsel %vm1050_vm2, %v1042_v51, 0 }
  0xf2   : > { %v1101_v58 = vsel %vm1050_vm2, %v1043_v52, 0  ;;  %v2126_v59 = vpop.f32.mrf.mxu0  ;;  %2184 = vmatpush3.bf16.xpose.msra.mxu0 %v1055_v57 }
  0xf3   : > { %v2134_v60 = vpop.f32.mrf.mxu1  ;;  %2190 = vmatpush3.bf16.xpose.msra.mxu1 %v1101_v58  ;;  %2195 = vmatprep.subr.bf16.mxu0 %v2428_v1 }
  0xf4   : > { %2201 = vmatprep.subr.bf16.mxu1 %v2428_v1  ;;  %v772_v2 = vpop.f32.mrf.mxu0 }
  0xf5   : > { %v824_v3 = vpop.f32.mrf.mxu1  ;;  %v773_v4 = vadd.f32 %v1953_v61, %v772_v2 }
  0xf6   : > { %v825_v5 = vadd.f32 %v1954_v62, %v824_v3  ;;  %v2141_v6 = vpop.f32.mrf.mxu0 }
  0xf7   : > { %v2149_v8 = vpop.f32.mrf.mxu1  ;;  %v1044_v11 = vpack.c.bf16 %v773_v4, %v773_v4 }
  0xf8   : > { %v1045_v12 = vpack.c.bf16 %v825_v5, %v825_v5  ;;  %v775_v15 = vpop.f32.mrf.mxu0 }
  0xf9   : > { %v827_v16 = vpop.f32.mrf.mxu1  ;;  %v1147_v17 = vsel %vm1050_vm2, %v1044_v11, 0  ;;  %2186 = vmatmul.mubr.msk.bf16.vlgmr.msra.gmra.mxu0 %vm1050_vm2, %v1038_v9 }
  0xfa   : > { %v1193_v18 = vsel %vm1050_vm2, %v1045_v12, 0  ;;  %2192 = vmatmul.mubr.msk.bf16.vlgmr.msra.gmra.mxu1 %vm1050_vm2, %v1039_v10  ;;  %v2142_v19 = vpop.f32.mrf.mxu0  ;;  %2196 = vmatpush3.bf16.xpose.msra.mxu0 %v1147_v17 }
  0xfb   : > { %v2150_v20 = vpop.f32.mrf.mxu1  ;;  %2202 = vmatpush3.bf16.xpose.msra.mxu1 %v1193_v18  ;;  %2197 = vmatprep.mubr.msk.bf16.mxu0 %vm2429_vm0, %v2428_v1 }
  0xfc   : > { %2203 = vmatprep.mubr.msk.bf16.mxu1 %vm2429_vm0, %v2428_v1  ;;  %2207 = vmatprep.subr.bf16.mxu0 %v2428_v1 }
  0xfd   : > { %2213 = vmatprep.subr.bf16.mxu1 %v2428_v1  ;;  %v876_v26 = vpop.f32.mrf.mxu0 }
  0xfe   : > { %v877_v27 = vadd.f32 %v1955_v25, %v876_v26 }
  0xff   : > { %v2157_v28 = vpop.f32.mrf.mxu0  ;;  %v928_v32 = vpop.f32.mrf.mxu1 }
 0x100   : > { %v1046_v30 = vpack.c.bf16 %v877_v27, %v877_v27  ;;  %v929_v34 = vadd.f32 %v1956_v29, %v928_v32  ;;  %v1957_v29 = vld [vmem:[%s2892_s2 + $0xa] ss:$0 sm:$0xff]  ;;  %v1958_v32 = vld [vmem:[%s2892_s2 + $0xb] ss:$0 sm:$0xff] }
 0x101   : > { %2198 = vmatmul.mubr.msk.bf16.vlgmr.msra.gmra.mxu0 %vm1050_vm2, %v1040_v23  ;;  %v879_v31 = vpop.f32.mrf.mxu0  ;;  %v2165_v36 = vpop.f32.mrf.mxu1 }
 0x102   : > { %2204 = vmatmul.mubr.msk.bf16.vlgmr.msra.gmra.mxu1 %vm1050_vm2, %v1041_v24  ;;  %2209 = vmatprep.mubr.msk.bf16.mxu0 %vm2429_vm0, %v2428_v1  ;;  %v1288_v33 = vsel %vm1286_vm3, %v1046_v30, 0  ;;  %v1047_v37 = vpack.c.bf16 %v929_v34, %v929_v34 }
 0x103   : > { %2215 = vmatprep.mubr.msk.bf16.mxu1 %vm2429_vm0, %v2428_v1  ;;  %v2158_v35 = vpop.f32.mrf.mxu0  ;;  %2208 = vmatpush3.bf16.msra.mxu0 %v1288_v33  ;;  %v931_v38 = vpop.f32.mrf.mxu1 }
 0x104   : > { %2219 = vmatprep.subr.bf16.mxu0 %v2428_v1  ;;  %v1334_v40 = vsel %vm1286_vm3, %v1047_v37, 0 }
 0x105   : > { %v2732_v39 = vpop.f32.mrf.mxu0  ;;  %v2166_v41 = vpop.f32.mrf.mxu1  ;;  %2214 = vmatpush3.bf16.msra.mxu1 %v1334_v40 }
 0x106   : > { %2225 = vmatprep.subr.bf16.mxu1 %v2428_v1  ;;  %v981_v31 = vadd.f32 %v1957_v29, %v2732_v39 }
 0x107   : > { %v2173_v42 = vpop.f32.mrf.mxu0  ;;  %v2736_v44 = vpop.f32.mrf.mxu1 }
 0x108   : > { %v1048_v35 = vpack.c.bf16 %v981_v31, %v981_v31  ;;  %v1033_v36 = vadd.f32 %v1958_v32, %v2736_v44  ;;  %v1472_v44 = vld [vmem:[%s2893_s3] sm:$0xf] }
 0x109   : > { %v983_v43 = vpop.f32.mrf.mxu0  ;;  %v2181_v46 = vpop.f32.mrf.mxu1  ;;  %v2811_v31 = vld [vmem:[%s2896_s6] sm:$0xff] }
 0x10a   : > { %v1380_v41 = vsel %vm1286_vm3, %v1048_v35, 0  ;;  %v1049_v42 = vpack.c.bf16 %v1033_v36, %v1033_v36 }
 0x10b   : > { %v2174_v45 = vpop.f32.mrf.mxu0  ;;  %v1035_v47 = vpop.f32.mrf.mxu1 }
 0x10c   : > { %v1426_v46 = vsel %vm1286_vm3, %v1049_v42, 0 }
 0x10d   : > { %v2182_v48 = vpop.f32.mrf.mxu1 }
 0x1b9   : > { %v1091_v49 = vpop.f32.mrf.mxu0 }
 0x1ba   : > { %v1137_v50 = vpop.f32.mrf.mxu1  ;;  %v1235_v51 = vsel %vm1050_vm2, %v1091_v49, -inf }
 0x1bb   : > { %1236 = vmax.xlane.f32.xlu0 %v1235_v51  ;;  %v2187_v53 = vpop.f32.mrf.mxu0  ;;  %v1238_v56 = vsel %vm1050_vm2, %v1137_v50, -inf }
 0x1bc   : > { %v2193_v52 = vpop.f32.mrf.mxu1  ;;  %v1473_v53 = vld [vmem:[%s2893_s3 + $0x4] sm:$0xf] }
 0x1bd   : > { %v1094_v54 = vpop.f32.mrf.mxu0 }
 0x1be   : > { %v1140_v55 = vpop.f32.mrf.mxu1  ;;  %v1526_v54 = vsel %vm1286_vm3, %v1473_v53, 0  ;;  %v2340_v53 = vld [vmem:[%s2894_s4 + $0x8] sm:$0xff]  }
 0x1bf   : > { %1239 = vmax.xlane.f32.xlu0 %v1238_v56  ;;  %v2188_v58 = vpop.f32.mrf.mxu0  ;;  %v1474_v55 = vld [vmem:[%s2893_s3 + $0x8] sm:$0xf] }
 0x1c0   : > { %v2194_v57 = vpop.f32.mrf.mxu1  ;;  %v1572_v58 = vsel %vm1286_vm3, %v1474_v55, 0  ;;  %v2343_v55 = vld [vmem:[%s2895_s5 + $0x10] sm:$0xff]  }
 0x1c1   : > { %v1183_v59 = vpop.f32.mrf.mxu0 }
 0x1c2   : > { %v1229_v60 = vpop.f32.mrf.mxu1  ;;  %v1241_v61 = vsel %vm1050_vm2, %v1183_v59, -inf }
 0x1c3   : > { %1242 = vmax.xlane.f32.xlu1 %v1241_v61  ;;  %v2199_v63 = vpop.f32.mrf.mxu0  ;;  %v1244_v3 = vsel %vm1050_vm2, %v1229_v60, -inf }
 0x1c4   : > { %v2205_v62 = vpop.f32.mrf.mxu1 }
 0x1c5   : > { %v1186_v0 = vpop.f32.mrf.mxu0 }
 0x1c6   : > { %v1232_v2 = vpop.f32.mrf.mxu1 }
 0x1c7   : > { %1245 = vmax.xlane.f32.xlu1 %v1244_v3  ;;  %v2200_v5 = vpop.f32.mrf.mxu0 }
 0x1c8   : > { %v2206_v4 = vpop.f32.mrf.mxu1 }
 0x244   : > { %v1237_v6 = vpop.xlane.xlu0 %1236 }
 0x245   : > { %v1247_v8 = vsub.f32 %v1091_v49, %v1237_v6  ;;  %v1480_v49 = vsel %vm1286_vm3, %v1472_v44, 0 }
 0x247   : > { %v1251_v9 = vmul.f32 1.442695, %v1247_v8 }
 0x248   : > { %v1240_v10 = vpop.xlane.xlu0 %1239 }
 0x249   : > { %2346 = vpow2.f32 %v1251_v9  ;;  %v1248_v11 = vsub.f32 %v1137_v50, %v1240_v10 }
 0x24b   : > { %v1253_v12 = vmul.f32 1.442695, %v1248_v11 }
 0x24c   : > { %v1243_v13 = vpop.xlane.xlu1 %1242 }
 0x24d   : > { %2348 = vpow2.f32 %v1253_v12  ;;  %v1249_v14 = vsub.f32 %v1183_v59, %v1243_v13 }
 0x24f   : > { %v1255_v15 = vmul.f32 1.442695, %v1249_v14 }
 0x250   : > { %v1246_v16 = vpop.xlane.xlu1 %1245 }
 0x251   : > { %2350 = vpow2.f32 %v1255_v15  ;;  %v1250_v17 = vsub.f32 %v1229_v60, %v1246_v16  ;;  %v1475_v60 = vld [vmem:[%s2893_s3 + $0xc] sm:$0xf] }
 0x252   : > { %v1618_v0 = vsel %vm1286_vm3, %v1475_v60, 0 }
 0x253   : > { %v1257_v18 = vmul.f32 1.442695, %v1250_v17 }
 0x255   : > { %2352 = vpow2.f32 %v1257_v18  ;;  %v1667_v18 = vlaneseq }
 0x256   : > { %v2347_v19 = vpop.eup %2346 }
 0x257   : > { %v1259_v20 = vsel %vm1050_vm2, %v2347_v19, 0.0 }
 0x258   : > { %1260 = vadd.xlane.f32.xlu0 %v1259_v20 }
 0x25a   : > { %v2349_v21 = vpop.eup %2348 }
 0x25b   : > { %v1262_v22 = vsel %vm1050_vm2, %v2349_v21, 0.0 }
 0x25c   : > { %1263 = vadd.xlane.f32.xlu1 %v1262_v22  ;;  %v2802_v22 = vshrl.u32 %v1667_v18, 7 }
 0x25e   : > { %v2351_v23 = vpop.eup %2350  ;;  %v1694_v60 = vsub.s32 4, %v2802_v22 }
 0x25f   : > { %v1265_v24 = vsel %vm1050_vm2, %v2351_v23, 0.0 }
 0x260   : > { %1266 = vadd.xlane.f32.xlu0 %v1265_v24 }
 0x262   : > { %v2353_v25 = vpop.eup %2352 }
 0x263   : > { %v1268_v26 = vsel %vm1050_vm2, %v2353_v25, 0.0 }
 0x264   : > { %1269 = vadd.xlane.f32.xlu1 %v1268_v26 }
 0x2e1   : > { %v1261_v27 = vpop.xlane.xlu0 %1260 }
 0x2e2   : > { %2354 = vrcp.f32 %v1261_v27 }
 0x2e5   : > { %v1264_v28 = vpop.xlane.xlu1 %1263 }
 0x2e6   : > { %2356 = vrcp.f32 %v1264_v28  ;;  %v1669_v28 = vsub.s32 0, %v2802_v22 }
 0x2e9   : > { %v1267_v30 = vpop.xlane.xlu0 %1266 }
 0x2ea   : > { %2358 = vrcp.f32 %v1267_v30 }
 0x2ed   : > { %v1270_v33 = vpop.xlane.xlu1 %1269 }
 0x2ee   : > { %2360 = vrcp.f32 %v1270_v33 }
 0x2ef   : > { %v2355_v34 = vpop.eup %2354 }
 0x2f0   : > { %v1272_v37 = vmul.f32 %v2355_v34, %v2347_v19 }
 0x2f2   : > { %v1279_v38 = vpack.c.bf16 %v1272_v37, %v1272_v37 }
 0x2f3   : > { %v2357_v40 = vpop.eup %2356 }
 0x2f4   : > { %2210 = vmatmul.mubr.msk.bf16.vlgmr.msra.gmra.mxu0 %vm1050_vm2, %v1279_v38  ;;  %v1274_v43 = vmul.f32 %v2357_v40, %v2349_v21  ;;  %v1670_v38 = vrot.slane %v2811_v31, %v1669_v28 }
 0x2f5   : > { %2220 = vmatpush3.bf16.msra.mxu0 %v1380_v41  ;;  %2221 = vmatprep.mubr.msk.bf16.mxu0 %vm2429_vm0, %v2428_v1 }
 0x2f6   : > { %v1280_v39 = vpack.c.bf16 %v1274_v43, %v1274_v43  ;;  %2231 = vmatprep.subr.bf16.mxu0 %v2428_v1 }
 0x2f7   : > { %v2359_v45 = vpop.eup %2358 }
 0x2f8   : > { %2216 = vmatmul.mubr.msk.bf16.vlgmr.msra.gmra.mxu1 %vm1050_vm2, %v1280_v39  ;;  %v1276_v47 = vmul.f32 %v2359_v45, %v2351_v23 }
 0x2f9   : > { %2226 = vmatpush3.bf16.msra.mxu1 %v1426_v46  ;;  %2227 = vmatprep.mubr.msk.bf16.mxu1 %vm2429_vm0, %v2428_v1 }
 0x2fa   : > { %v1281_v48 = vpack.c.bf16 %v1276_v47, %v1276_v47  ;;  %2237 = vmatprep.subr.bf16.mxu1 %v2428_v1 }
 0x2fb   : > { %v2361_v50 = vpop.eup %2360 }
 0x2fc   : > { %2222 = vmatmul.mubr.msk.bf16.vlgmr.msra.gmra.mxu0 %vm1050_vm2, %v1281_v48  ;;  %v1278_v51 = vmul.f32 %v2361_v50, %v2353_v25 }
 0x2fd   : > { %2232 = vmatpush3.bf16.msra.mxu0 %v1480_v49  ;;  %2233 = vmatprep.mubr.msk.bf16.mxu0 %vm2429_vm0, %v2428_v1 }
 0x2fe   : > { %v1282_v52 = vpack.c.bf16 %v1278_v51, %v1278_v51  ;;  %2243 = vmatprep.subr.bf16.mxu0 %v2428_v1 }
 0x300   : > { %2228 = vmatmul.mubr.msk.bf16.vlgmr.msra.gmra.mxu1 %vm1050_vm2, %v1282_v52 }
 0x301   : > { %2239 = vmatprep.mubr.msk.bf16.mxu1 %vm2429_vm0, %v2428_v1  ;;  %2238 = vmatpush3.bf16.msra.mxu1 %v1526_v54  ;;  %v2341_v54 = vld [vmem:[%s2894_s4] sm:$0xff]  }
 0x302   : > { %2249 = vmatprep.subr.bf16.mxu1 %v2428_v1 }
 0x3b4   : > { %v1324_v56 = vpop.f32.mrf.mxu0 }
 0x3b5   : > { %v1468_v57 = vpack.c.bf16 %v1324_v56, %v1324_v56 }
 0x3b6   : > { %v2211_v59 = vpop.f32.mrf.mxu0 }
 0x3b7   : > { %2234 = vmatmul.mubr.msk.bf16.vlgmr.msra.gmra.mxu0 %vm1050_vm2, %v1468_v57  ;;  %v1689_v59 = vsub.s32 3, %v2802_v22 }
 0x3b8   : > { %v1327_v61 = vpop.f32.mrf.mxu0  ;;  %v1370_v62 = vpop.f32.mrf.mxu1  ;;  %2244 = vmatpush3.bf16.msra.mxu0 %v1572_v58  ;;  %2245 = vmatprep.mubr.msk.bf16.mxu0 %vm2429_vm0, %v2428_v1 }
 0x3b9   : > { %v1469_v63 = vpack.c.bf16 %v1370_v62, %v1370_v62  ;;  %2255 = vmatprep.subr.bf16.mxu0 %v2428_v1  ;;  %v1690_v61 = vrot.slane %v2811_v31, %v1689_v59 }
 0x3ba   : > { %v2212_v2 = vpop.f32.mrf.mxu0  ;;  %v2217_v3 = vpop.f32.mrf.mxu1 }
 0x3bb   : > { %2240 = vmatmul.mubr.msk.bf16.vlgmr.msra.gmra.mxu1 %vm1050_vm2, %v1469_v63 }
 0x3bc   : > { %v1373_v4 = vpop.f32.mrf.mxu1  ;;  %v1416_v5 = vpop.f32.mrf.mxu0  ;;  %2250 = vmatpush3.bf16.msra.mxu1 %v1618_v0  ;;  %2251 = vmatprep.mubr.msk.bf16.mxu1 %vm2429_vm0, %v2428_v1  ;;  %v1695_v0 = vrot.slane %v2811_v31, %v1694_v60 }
 0x3bd   : > { %v1470_v6 = vpack.c.bf16 %v1416_v5, %v1416_v5  ;;  %2263 = vmatprep.subr.bf16.mxu1 %v2428_v1  ;;  %v2344_v5 = vld [vmem:[%s2895_s5 + $0x8] sm:$0xff]  }
 0x3be   : > { %v2218_v8 = vpop.f32.mrf.mxu1  ;;  %v2223_v9 = vpop.f32.mrf.mxu0 }
 0x3bf   : > { %2246 = vmatmul.mubr.msk.bf16.vlgmr.msra.gmra.mxu0 %vm1050_vm2, %v1470_v6  ;;  %v2345_v6 = vld [vmem:[%s2895_s5] sm:$0xff]   ;;  %v1704_v8 = vsub.s32 1, %v2802_v22 }
 0x3c0   : > { %v1419_v10 = vpop.f32.mrf.mxu0  ;;  %v1462_v11 = vpop.f32.mrf.mxu1  ;;  %2259 = vmatprep.mubr.msk.bf16.mxu0 %vm2429_vm0, %v2428_v1  ;;  %2256 = vmatpush3.bf16.msra.mxu0 %v2340_v53 }
 0x3c1   : > { %v1471_v12 = vpack.c.bf16 %v1462_v11, %v1462_v11  ;;  %2257 = vmatprep.subr.bf16.mxu0 %v2428_v1  ;;  %v1705_v9 = vrot.slane %v2811_v31, %v1704_v8 }
 0x3c2   : > { %v2224_v13 = vpop.f32.mrf.mxu0  ;;  %v2229_v14 = vpop.f32.mrf.mxu1 }
 0x3c3   : > { %2252 = vmatmul.mubr.msk.bf16.vlgmr.msra.gmra.mxu1 %vm1050_vm2, %v1471_v12 }
 0x3c4   : > { %v1465_v15 = vpop.f32.mrf.mxu1  ;;  %2271 = vmatprep.mubr.msk.bf16.mxu1 %vm2429_vm0, %v2428_v1  ;;  %2258 = vmatpush3.bf16.msra.mxu0 %v2341_v54 }
 0x3c6   : > { %v2230_v16 = vpop.f32.mrf.mxu1 }
 0x477   : > { %v1516_v17 = vpop.f32.mrf.mxu0 }
 0x478   : > { %v1660_v29 = vsel %vm422_vm1, %v1516_v17, 0.0 }
 0x479   : > { %v2235_v19 = vpop.f32.mrf.mxu0 }
 0x47b   : > { %v1519_v20 = vpop.f32.mrf.mxu0  ;;  %v1562_v21 = vpop.f32.mrf.mxu1 }
 0x47c   : > { %v1661_v25 = vsel %vm422_vm1, %v1562_v21, 0.0 }
 0x47d   : > { %v2236_v23 = vpop.f32.mrf.mxu0  ;;  %v2241_v24 = vpop.f32.mrf.mxu1  ;;  %v1662_v32 = vadd.f32 %v1661_v25, %v1660_v29 }
 0x47f   : > { %v1565_v26 = vpop.f32.mrf.mxu1  ;;  %v1608_v27 = vpop.f32.mrf.mxu0 }
 0x480   : > { %v1663_v30 = vsel %vm422_vm1, %v1608_v27, 0.0 }
 0x481   : > { %v2242_v33 = vpop.f32.mrf.mxu1  ;;  %v2247_v34 = vpop.f32.mrf.mxu0  ;;  %v1664_v35 = vadd.f32 %v1663_v30, %v1662_v32 }
 0x483   : > { %v1611_v36 = vpop.f32.mrf.mxu0  ;;  %v1654_v37 = vpop.f32.mrf.mxu1 }
 0x484   : > { %v1665_v40 = vsel %vm422_vm1, %v1654_v37, 0.0  ;;  %v1864_v36 = vsub.s32 6, %v2802_v22 }
 0x485   : > { %v1666_v41 = vadd.f32 %v1665_v40, %v1664_v35  ;;  %v2248_v42 = vpop.f32.mrf.mxu0  ;;  %v2253_v43 = vpop.f32.mrf.mxu1  ;;  %v1859_v35 = vsub.s32 5, %v2802_v22 }
 0x487   : > { %v1671_v39 = vadd.f32 %v1670_v38, %v1666_v41  ;;  %v1657_v45 = vpop.f32.mrf.mxu1  ;;  %v1860_v37 = vrot.slane %v2811_v31, %v1859_v35  ;;  %v1865_v41 = vrot.slane %v2811_v31, %v1864_v36 }
 0x489   : > { %v2254_v44 = vpop.f32.mrf.mxu1  ;;  %v1672_v46 = vadd.f32 %v1671_v39, %v2551_v7  ;;  %v2342_v7 = vld [vmem:[%s2895_s5 + $0x18] sm:$0xff]  }
 0x48a   : > { %2264 = vmatpush3.bf16.msra.mxu1 %v2342_v7 }
 0x48b   : > { %v1673_v47 = vsel %vm422_vm1, %v1672_v46, 0.0  ;;  %2265 = vmatprep.subr.bf16.mxu1 %v2428_v1 }
 0x48c   : > { %1674 = vadd.xlane.f32.xlu0 %v1673_v47 }
 0x48e   : > { %2266 = vmatpush3.bf16.msra.mxu1 %v2343_v55 }
 0x48f   : > { %2267 = vmatprep.subr.bf16.mxu1 %v2428_v1 }
 0x492   : > { %2268 = vmatpush3.bf16.msra.mxu1 %v2344_v5 }
 0x493   : > { %2269 = vmatprep.subr.bf16.mxu1 %v2428_v1  ;;  %v1773_v1 = vsub.s32 2, %v2802_v22 }
 0x495   : > { %v1774_v17 = vrot.slane %v2811_v31, %v1773_v1 }
 0x496   : > { %2270 = vmatpush3.bf16.msra.mxu1 %v2345_v6 }
 0x515   : > { %v1675_v48 = vpop.xlane.xlu0 %1674 }
 0x516   : > { %v1677_v49 = vmul.f32 0.03125, %v1675_v48 }
 0x518   : > { %v1678_v50 = vsub.f32 %v1672_v46, %v1677_v49 }
 0x51a   : > { %v1679_v51 = vmul.f32 %v1678_v50, %v1678_v50 }
 0x51c   : > { %v1680_v52 = vsel %vm422_vm1, %v1679_v51, 0.0 }
 0x51d   : > { %1681 = vadd.xlane.f32.xlu1 %v1680_v52 }
 0x5a6   : > { %v1682_v56 = vpop.xlane.xlu1 %1681 }
 0x5a7   : > { %v1683_v57 = vmul.f32 0.03125, %v1682_v56 }
 0x5a9   : > { %v1684_v58 = vadd.f32 1e-05, %v1683_v57 }
 0x5ab   : > { %2362 = vrsqrt.f32 %v1684_v58 }
 0x5b8   : > { %v2363_v62 = vpop.eup %2362 }
 0x5b9   : > { %v1686_v63 = vmul.f32 %v2363_v62, %v1678_v50 }
 0x5bb   : > { %v1691_v2 = vmul.f32 %v1690_v61, %v1686_v63 }
 0x5bd   : > { %v1696_v3 = vadd.f32 %v1695_v0, %v1691_v2 }
 0x5bf   : > { %v1697_v4 = vpack.c.bf16 %v1696_v3, %v1696_v3 }
 0x5c1   : > { %2260 = vmatmul.mubr.msk.bf16.vlgmr.msra.gmra.mxu0 %vm422_vm1, %v1697_v4 }
 0x681   : > { %v1755_v10 = vpop.f32.mrf.mxu0 }
 0x682   : > { %v1756_v11 = vadd.f32 %v1755_v10, %v1705_v9 }
 0x683   : > { %v2261_v12 = vpop.f32.mrf.mxu0 }
 0x684   : > { %v1761_v13 = vmax.f32 %v1756_v11, 0.0 }
 0x685   : > { %v1758_v14 = vpop.f32.mrf.mxu0 }
 0x686   : > { %v1762_v15 = vpack.c.bf16 %v1761_v13, %v1761_v13 }
 0x687   : > { %v2262_v16 = vpop.f32.mrf.mxu0 }
 0x688   : > { %2272 = vmatmul.mubr.msk.bf16.vlgmr.msra.gmra.mxu1 %vm1799_vm4, %v1762_v15 }
 0x748   : > { %v1837_v18 = vpop.f32.mrf.mxu1 }
 0x749   : > { %v1838_v19 = vadd.f32 %v1837_v18, %v1774_v17 }
 0x74a   : > { %v2273_v20 = vpop.f32.mrf.mxu1 }
 0x74b   : > { %v1843_v21 = vadd.f32 %v1838_v19, %v1696_v3 }
 0x74c   : > { %v1840_v23 = vpop.f32.mrf.mxu1 }
 0x74d   : > { %v1844_v24 = vsel %vm422_vm1, %v1843_v21, 0.0 }
 0x74e   : > { %1845 = vadd.xlane.f32.xlu0 %v1844_v24  ;;  %v2274_v25 = vpop.f32.mrf.mxu1 }
 0x7d7   : > { %v1846_v26 = vpop.xlane.xlu0 %1845 }
 0x7d8   : > { %v1847_v27 = vmul.f32 0.03125, %v1846_v26 }
 0x7da   : > { %v1848_v28 = vsub.f32 %v1843_v21, %v1847_v27 }
 0x7dc   : > { %v1849_v29 = vmul.f32 %v1848_v28, %v1848_v28 }
 0x7de   : > { %v1850_v30 = vsel %vm422_vm1, %v1849_v29, 0.0 }
 0x7df   : > { %1851 = vadd.xlane.f32.xlu1 %v1850_v30 }
 0x868   : > { %v1852_v32 = vpop.xlane.xlu1 %1851 }
 0x869   : > { %v1853_v33 = vmul.f32 0.03125, %v1852_v32 }
 0x86b   : > { %v1854_v34 = vadd.f32 1e-05, %v1853_v33 }
 0x86d   : > { %2364 = vrsqrt.f32 %v1854_v34 }
 0x87a   : > { %v2365_v38 = vpop.eup %2364 }
 0x87b   : > { %v1856_v40 = vmul.f32 %v2365_v38, %v1848_v28 }
 0x87d   : > { %v1861_v42 = vmul.f32 %v1860_v37, %v1856_v40 }
 0x87f   : > { %v1866_v43 = vadd.f32 %v1865_v41, %v1861_v42 }
 0x881   : > { %1867 = vst.msk [vmem:[%s269_s17] sm:$0xff] %vm422_vm1, %v1866_v43 }
 0x882   : > { %2379 = shalt.err (!%p2376_p3)
}
 0x883   : > { %s2380_s9 = scalar_lea.hbm %s1880_s21, 128  ;;  %s2384_s15 = scalar_lea.hbm %s2897_s7, 256 }
 0x884   : > { %p2381_p4 = scmp.ne.s32.totalorder %s1880_s21, %s2380_s9  ;;  %p2385_p9 = scmp.lt.s32.totalorder %s1880_s21, %s2897_s7 }
 0x885   : > { %p2386_p10 = scmp.lt.s32.totalorder %s2384_s15, %s2380_s9 }
 0x886   : > { %p2382_p7 = pnand %p2381_p4, %p2509_p5 }
 0x887   : > { %p2387_p11 = por %p2386_p10, %p2385_p9 }
 0x888   : > { %p2383_p8 = pneg %p2382_p7 }
 0x88a   : > { %p2388_p12 = pnand %p2387_p11, %p2383_p8 }
 0x88c   : > { %2391 = shalt.err (!%p2388_p12)
}
 0x88d   : > { %2275 = dma.vmem_to_hbm [thread:$0]  (%p2509_p5), %s1883_s18, 128, %s1880_s21, %s1869_s22  }
 0x88e PF: > { %p2281_p13 = scmp.ge.s32.totalorder %s2426_s27, 2  ;;  %s1894_s19 = sand.u32 1, %s2414_s24  }
 0x88f   : > { %s1895_s20 = scalar_lea.sflag [#allocation3], %s1894_s19 }
 0x890   : > { %p2278_p0 = pnand %p2281_p13, %p2513_p6 }
 0x892   : > { %p2279_p1 = pneg %p2278_p0 }
 0x894   : > { %2409 = dma.done.wait (%p2279_p1), %s1895_s20, 128  }
 0x895   : > { %2411 = vsyncadd (%p2279_p1), %s1895_s20, 4294967168  ;;  %p17_p2 = scmp.ge.s32.totalorder %s2496_s30, 4   ;;  %s2900_s24 = smov %s2418_s25 }
 0x896   : > { %s2901_s25 = smov %s2422_s26  ;;  %s2902_s26 = smov %s2507_s10 }
 0x897   : > { %s2903_s27 = smov %s2496_s30  ;;  %19 = sbr.rel (!%p17_p2) target bundleno = 3 (0x3), region = 83 }
 0x89c   :  { %1900 = vsyncpa [#allocation3], 1 }
 0x89d   :  { %1902 = vsyncpa [#allocation3 + $0x1], 1 }

</bundles_post_ra>
